<compile_context>
chip_gen: v6e
topology: v6e:2x2x1
jax: 0.10.0
libtpu: 0.0.40
codegen_flags: <defaults>
</compile_context>

<pallas_src>
import functools

import jax
import jax.numpy as jnp
from jax.experimental import pallas as pl
from jax.experimental.pallas import tpu as pltpu

_LANE = 128


def _norm_inv_cdf(u):
    """Acklam's rational approximation of the standard normal inverse CDF.

    Uses only +, *, /, log, sqrt, where — portable to Mosaic and interpret.
    |relative error| < 1.2e-9 (well below f32 rounding).
    """
    a0, a1, a2, a3, a4, a5 = (-3.969683028665376e+01, 2.209460984245205e+02,
                              -2.759285104469687e+02, 1.383577518672690e+02,
                              -3.066479806614716e+01, 2.506628277459239e+00)
    b0, b1, b2, b3, b4 = (-5.447609879822406e+01, 1.615858368580409e+02,
                          -1.556989798598866e+02, 6.680131188771972e+01,
                          -1.328068155288572e+01)
    c0, c1, c2, c3, c4, c5 = (-7.784894002430293e-03, -3.223964580411365e-01,
                              -2.400758277161838e+00, -2.549732539343734e+00,
                              4.374664141464968e+00, 2.938163982698783e+00)
    d0, d1, d2, d3 = (7.784695709041462e-03, 3.224671290700398e-01,
                      2.445134137142996e+00, 3.754408661907416e+00)
    p_low = 0.02425

    # Central region: |u - 0.5| <= 0.5 - p_low.
    q = u - 0.5
    r = q * q
    num_c = (((((a0 * r + a1) * r + a2) * r + a3) * r + a4) * r + a5) * q
    den_c = ((((b0 * r + b1) * r + b2) * r + b3) * r + b4) * r + 1.0
    z_central = num_c / den_c

    # Tails: evaluate at min(u, 1 - u) (strictly positive) and fix the sign.
    p = jnp.minimum(u, 1.0 - u)
    s = jnp.sqrt(-2.0 * jnp.log(p))
    num_t = ((((c0 * s + c1) * s + c2) * s + c3) * s + c4) * s + c5
    den_t = (((d0 * s + d1) * s + d2) * s + d3) * s + 1.0
    z_t = num_t / den_t                      # quantile of p (negative)
    z_tail = jnp.where(u < 0.5, z_t, -z_t)

    return jnp.where(p < p_low, z_tail, z_central)


def _gaussian_noise_kernel(seed_ref, x_ref, o_ref, *, stddev, row_tile, n_cols):
    i = pl.program_id(0)
    seed = seed_ref[0]

    shape = x_ref.shape                       # (row_tile, n_cols), static
    row = jax.lax.broadcasted_iota(jnp.int32, shape, 0)
    col = jax.lax.broadcasted_iota(jnp.int32, shape, 1)
    # Global element index (wraps mod 2**32 for huge tensors; fine for a hash).
    gidx = (row + i * row_tile) * n_cols + col

    # Counter-based PRNG: lowbias32-style mix of (index, seed).  int32 mul/add
    # wrap mod 2**32; `(h >> k) & mask` emulates a logical right shift so the
    # whole hash stays in plain int32 (portable lowering on VPU).
    h = gidx ^ (seed * (-1640531527))         # seed * 0x9E3779B9
    h = h ^ ((h >> 16) & 0xFFFF)
    h = h * 0x7FEB352D
    h = h ^ ((h >> 15) & 0x1FFFF)
    h = h * (-2073401717)                     # 0x846CA68B
    h = h ^ ((h >> 16) & 0xFFFF)

    bits24 = (h >> 8) & 0xFFFFFF              # top 24 bits, in [0, 2**24)
    u = (bits24.astype(jnp.float32) + 0.5) * (1.0 / 16777216.0)   # (0, 1)

    noise = _norm_inv_cdf(u) * jnp.float32(stddev)
    o_ref[...] = (x_ref[...].astype(jnp.float32) + noise).astype(o_ref.dtype)


def gaussian_noise(x, stddev, seed):
    """Forward of GaussianNoise: x + N(0, stddev**2) noise of the same shape."""
    orig_shape = x.shape
    orig_dtype = x.dtype
    total = x.size

    # Lane-dense 2-D view: pick the widest last dim (multiple of 128) that
    # divides the element count -> no pad / slice round trip in the common case.
    pad = 0
    n_cols = None
    for width in (1024, 512, 256, _LANE):
        if total % width == 0:
            n_cols = width
            break
    if n_cols is None:
        # Ragged fallback: pad only the small flat remainder.
        n_cols = _LANE
        pad = (-total) % _LANE
        flat = jnp.pad(x.reshape(-1), (0, pad)).reshape(-1, n_cols)
    else:
        flat = x.reshape(-1, n_cols)

    rows = flat.shape[0]
    # ~1 MiB f32 per block buffer; full extent if the array is smaller.
    target_rows = max(8, (1 << 18) // n_cols)
    row_tile = min(rows, target_rows)
    grid = (pl.cdiv(rows, row_tile),)

    seed_arr = jnp.asarray([seed], dtype=jnp.int32)
    kernel = functools.partial(_gaussian_noise_kernel, stddev=float(stddev),
                               row_tile=row_tile, n_cols=n_cols)

    out2d = pl.pallas_call(
        kernel,
        out_shape=jax.ShapeDtypeStruct(flat.shape, orig_dtype),
        grid_spec=pltpu.PrefetchScalarGridSpec(
            num_scalar_prefetch=1,                     # seed lands in SMEM
            grid=grid,
            in_specs=[pl.BlockSpec((row_tile, n_cols), lambda i, s: (i, 0))],
            out_specs=pl.BlockSpec((row_tile, n_cols), lambda i, s: (i, 0)),
        ),
        compiler_params=pltpu.CompilerParams(
            dimension_semantics=("parallel",),         # v7x: shard over both TCs
        ),
    )(seed_arr, flat)

    # TODO(synk): optionally pass input_output_aliases={1: 0} when the caller
    # can donate x, to update the tensor in place.
    if pad:
        return out2d.reshape(-1)[:total].reshape(orig_shape)
    return out2d.reshape(orig_shape)


if __name__ == "__main__":
    key = jax.random.PRNGKey(0)
    # Small NCHW input consistent with a CNN feature map.
    x = jax.random.normal(key, (2, 4, 16, 16), dtype=jnp.float32)
    stddev = 0.1

    out = gaussian_noise(x, stddev, seed=0)
    out = jax.block_until_ready(out)

    # Basic sanity: same shape/dtype, and the added noise has the right scale.
    assert out.shape == x.shape and out.dtype == x.dtype
    noise = out - x
    assert float(jnp.abs(jnp.mean(noise))) < 0.05
    assert 0.05 < float(jnp.std(noise)) < 0.2

    print("KERNEL_OK")
</pallas_src>

<mosaic_0001>
module attributes {stable_mosaic.version = 11 : i64} {
  func.func @_gaussian_noise_kernel(%arg0: i32, %arg1: memref<1xi32, #tpu.memory_space<smem>>, %arg2: memref<2x1024xf32, #tpu.memory_space<vmem>>, %arg3: memref<2x1024xf32, #tpu.memory_space<vmem>>) attributes {dimension_semantics = [#tpu.dimension_semantics<parallel>], iteration_bounds = array<i64: 1>, scalar_prefetch = 1 : i64, scratch_operands = 0 : i64, tpu.core_type = #tpu.core_type<tc>, window_params = [{transform_indices = @transform_0, window_bounds = array<i64: 2, 1024>}, {transform_indices = @transform_1, window_bounds = array<i64: 2, 1024>}]} {
    %c0 = arith.constant 0 : index
    %0 = memref.load %arg1[%c0] : memref<1xi32, #tpu.memory_space<smem>>
    %1 = tpu.iota {dimensions = array<i32: 0>} : vector<2x1024xi32>
    %2 = tpu.iota {dimensions = array<i32: 1>} : vector<2x1024xi32>
    %c2_i32 = arith.constant 2 : i32
    %3 = arith.muli %arg0, %c2_i32 : i32
    %4 = vector.broadcast %3 : i32 to vector<2x1024xi32>
    %5 = arith.addi %1, %4 : vector<2x1024xi32>
    %c1024_i32 = arith.constant 1024 : i32
    %6 = vector.broadcast %c1024_i32 : i32 to vector<2x1024xi32>
    %7 = arith.muli %5, %6 : vector<2x1024xi32>
    %8 = arith.addi %7, %2 : vector<2x1024xi32>
    %c-1640531527_i32 = arith.constant -1640531527 : i32
    %9 = arith.muli %0, %c-1640531527_i32 : i32
    %10 = vector.broadcast %9 : i32 to vector<2x1024xi32>
    %11 = arith.xori %8, %10 : vector<2x1024xi32>
    %c16_i32 = arith.constant 16 : i32
    %12 = vector.broadcast %c16_i32 : i32 to vector<2x1024xi32>
    %13 = arith.shrsi %11, %12 : vector<2x1024xi32>
    %c65535_i32 = arith.constant 65535 : i32
    %14 = vector.broadcast %c65535_i32 : i32 to vector<2x1024xi32>
    %15 = arith.andi %13, %14 : vector<2x1024xi32>
    %16 = arith.xori %11, %15 : vector<2x1024xi32>
    %c2146121005_i32 = arith.constant 2146121005 : i32
    %17 = vector.broadcast %c2146121005_i32 : i32 to vector<2x1024xi32>
    %18 = arith.muli %16, %17 : vector<2x1024xi32>
    %c15_i32 = arith.constant 15 : i32
    %19 = vector.broadcast %c15_i32 : i32 to vector<2x1024xi32>
    %20 = arith.shrsi %18, %19 : vector<2x1024xi32>
    %c131071_i32 = arith.constant 131071 : i32
    %21 = vector.broadcast %c131071_i32 : i32 to vector<2x1024xi32>
    %22 = arith.andi %20, %21 : vector<2x1024xi32>
    %23 = arith.xori %18, %22 : vector<2x1024xi32>
    %c-2073401717_i32 = arith.constant -2073401717 : i32
    %24 = vector.broadcast %c-2073401717_i32 : i32 to vector<2x1024xi32>
    %25 = arith.muli %23, %24 : vector<2x1024xi32>
    %c16_i32_0 = arith.constant 16 : i32
    %26 = vector.broadcast %c16_i32_0 : i32 to vector<2x1024xi32>
    %27 = arith.shrsi %25, %26 : vector<2x1024xi32>
    %c65535_i32_1 = arith.constant 65535 : i32
    %28 = vector.broadcast %c65535_i32_1 : i32 to vector<2x1024xi32>
    %29 = arith.andi %27, %28 : vector<2x1024xi32>
    %30 = arith.xori %25, %29 : vector<2x1024xi32>
    %c8_i32 = arith.constant 8 : i32
    %31 = vector.broadcast %c8_i32 : i32 to vector<2x1024xi32>
    %32 = arith.shrsi %30, %31 : vector<2x1024xi32>
    %c16777215_i32 = arith.constant 16777215 : i32
    %33 = vector.broadcast %c16777215_i32 : i32 to vector<2x1024xi32>
    %34 = arith.andi %32, %33 : vector<2x1024xi32>
    %35 = arith.sitofp %34 : vector<2x1024xi32> to vector<2x1024xf32>
    %cst = arith.constant 5.000000e-01 : f32
    %36 = vector.broadcast %cst : f32 to vector<2x1024xf32>
    %37 = arith.addf %35, %36 : vector<2x1024xf32>
    %cst_2 = arith.constant 5.96046448E-8 : f32
    %38 = vector.broadcast %cst_2 : f32 to vector<2x1024xf32>
    %39 = arith.mulf %37, %38 : vector<2x1024xf32>
    %cst_3 = arith.constant 5.000000e-01 : f32
    %40 = vector.broadcast %cst_3 : f32 to vector<2x1024xf32>
    %41 = arith.subf %39, %40 : vector<2x1024xf32>
    %42 = arith.mulf %41, %41 : vector<2x1024xf32>
    %cst_4 = arith.constant -39.6968307 : f32
    %43 = vector.broadcast %cst_4 : f32 to vector<2x1024xf32>
    %44 = arith.mulf %43, %42 : vector<2x1024xf32>
    %cst_5 = arith.constant 220.946106 : f32
    %45 = vector.broadcast %cst_5 : f32 to vector<2x1024xf32>
    %46 = arith.addf %44, %45 : vector<2x1024xf32>
    %47 = arith.mulf %46, %42 : vector<2x1024xf32>
    %cst_6 = arith.constant -275.928497 : f32
    %48 = vector.broadcast %cst_6 : f32 to vector<2x1024xf32>
    %49 = arith.addf %47, %48 : vector<2x1024xf32>
    %50 = arith.mulf %49, %42 : vector<2x1024xf32>
    %cst_7 = arith.constant 138.357758 : f32
    %51 = vector.broadcast %cst_7 : f32 to vector<2x1024xf32>
    %52 = arith.addf %50, %51 : vector<2x1024xf32>
    %53 = arith.mulf %52, %42 : vector<2x1024xf32>
    %cst_8 = arith.constant -30.6647987 : f32
    %54 = vector.broadcast %cst_8 : f32 to vector<2x1024xf32>
    %55 = arith.addf %53, %54 : vector<2x1024xf32>
    %56 = arith.mulf %55, %42 : vector<2x1024xf32>
    %cst_9 = arith.constant 2.50662827 : f32
    %57 = vector.broadcast %cst_9 : f32 to vector<2x1024xf32>
    %58 = arith.addf %56, %57 : vector<2x1024xf32>
    %59 = arith.mulf %58, %41 : vector<2x1024xf32>
    %cst_10 = arith.constant -54.4760971 : f32
    %60 = vector.broadcast %cst_10 : f32 to vector<2x1024xf32>
    %61 = arith.mulf %60, %42 : vector<2x1024xf32>
    %cst_11 = arith.constant 161.585831 : f32
    %62 = vector.broadcast %cst_11 : f32 to vector<2x1024xf32>
    %63 = arith.addf %61, %62 : vector<2x1024xf32>
    %64 = arith.mulf %63, %42 : vector<2x1024xf32>
    %cst_12 = arith.constant -155.698975 : f32
    %65 = vector.broadcast %cst_12 : f32 to vector<2x1024xf32>
    %66 = arith.addf %64, %65 : vector<2x1024xf32>
    %67 = arith.mulf %66, %42 : vector<2x1024xf32>
    %cst_13 = arith.constant 66.8013153 : f32
    %68 = vector.broadcast %cst_13 : f32 to vector<2x1024xf32>
    %69 = arith.addf %67, %68 : vector<2x1024xf32>
    %70 = arith.mulf %69, %42 : vector<2x1024xf32>
    %cst_14 = arith.constant -13.2806816 : f32
    %71 = vector.broadcast %cst_14 : f32 to vector<2x1024xf32>
    %72 = arith.addf %70, %71 : vector<2x1024xf32>
    %73 = arith.mulf %72, %42 : vector<2x1024xf32>
    %cst_15 = arith.constant 1.000000e+00 : f32
    %74 = vector.broadcast %cst_15 : f32 to vector<2x1024xf32>
    %75 = arith.addf %73, %74 : vector<2x1024xf32>
    %76 = arith.divf %59, %75 : vector<2x1024xf32>
    %cst_16 = arith.constant 1.000000e+00 : f32
    %77 = vector.broadcast %cst_16 : f32 to vector<2x1024xf32>
    %78 = arith.subf %77, %39 : vector<2x1024xf32>
    %79 = arith.minimumf %39, %78 : vector<2x1024xf32>
    %80 = math.log %79 : vector<2x1024xf32>
    %cst_17 = arith.constant -2.000000e+00 : f32
    %81 = vector.broadcast %cst_17 : f32 to vector<2x1024xf32>
    %82 = arith.mulf %81, %80 : vector<2x1024xf32>
    %83 = math.sqrt %82 : vector<2x1024xf32>
    %cst_18 = arith.constant -0.0077848942 : f32
    %84 = vector.broadcast %cst_18 : f32 to vector<2x1024xf32>
    %85 = arith.mulf %84, %83 : vector<2x1024xf32>
    %cst_19 = arith.constant -0.322396457 : f32
    %86 = vector.broadcast %cst_19 : f32 to vector<2x1024xf32>
    %87 = arith.addf %85, %86 : vector<2x1024xf32>
    %88 = arith.mulf %87, %83 : vector<2x1024xf32>
    %cst_20 = arith.constant -2.40075827 : f32
    %89 = vector.broadcast %cst_20 : f32 to vector<2x1024xf32>
    %90 = arith.addf %88, %89 : vector<2x1024xf32>
    %91 = arith.mulf %90, %83 : vector<2x1024xf32>
    %cst_21 = arith.constant -2.54973245 : f32
    %92 = vector.broadcast %cst_21 : f32 to vector<2x1024xf32>
    %93 = arith.addf %91, %92 : vector<2x1024xf32>
    %94 = arith.mulf %93, %83 : vector<2x1024xf32>
    %cst_22 = arith.constant 4.37466431 : f32
    %95 = vector.broadcast %cst_22 : f32 to vector<2x1024xf32>
    %96 = arith.addf %94, %95 : vector<2x1024xf32>
    %97 = arith.mulf %96, %83 : vector<2x1024xf32>
    %cst_23 = arith.constant 2.938164 : f32
    %98 = vector.broadcast %cst_23 : f32 to vector<2x1024xf32>
    %99 = arith.addf %97, %98 : vector<2x1024xf32>
    %cst_24 = arith.constant 0.00778469583 : f32
    %100 = vector.broadcast %cst_24 : f32 to vector<2x1024xf32>
    %101 = arith.mulf %100, %83 : vector<2x1024xf32>
    %cst_25 = arith.constant 0.322467119 : f32
    %102 = vector.broadcast %cst_25 : f32 to vector<2x1024xf32>
    %103 = arith.addf %101, %102 : vector<2x1024xf32>
    %104 = arith.mulf %103, %83 : vector<2x1024xf32>
    %cst_26 = arith.constant 2.44513416 : f32
    %105 = vector.broadcast %cst_26 : f32 to vector<2x1024xf32>
    %106 = arith.addf %104, %105 : vector<2x1024xf32>
    %107 = arith.mulf %106, %83 : vector<2x1024xf32>
    %cst_27 = arith.constant 3.7544086 : f32
    %108 = vector.broadcast %cst_27 : f32 to vector<2x1024xf32>
    %109 = arith.addf %107, %108 : vector<2x1024xf32>
    %110 = arith.mulf %109, %83 : vector<2x1024xf32>
    %cst_28 = arith.constant 1.000000e+00 : f32
    %111 = vector.broadcast %cst_28 : f32 to vector<2x1024xf32>
    %112 = arith.addf %110, %111 : vector<2x1024xf32>
    %113 = arith.divf %99, %112 : vector<2x1024xf32>
    %cst_29 = arith.constant 5.000000e-01 : f32
    %114 = vector.broadcast %cst_29 : f32 to vector<2x1024xf32>
    %115 = arith.cmpf olt, %39, %114 : vector<2x1024xf32>
    %cst_30 = arith.constant 0.000000e+00 : f32
    %116 = vector.broadcast %cst_30 : f32 to vector<2x1024xf32>
    %117 = arith.subf %116, %113 : vector<2x1024xf32>
    %118 = arith.select %115, %113, %117 : vector<2x1024xi1>, vector<2x1024xf32>
    %cst_31 = arith.constant 2.425000e-02 : f32
    %119 = vector.broadcast %cst_31 : f32 to vector<2x1024xf32>
    %120 = arith.cmpf olt, %79, %119 : vector<2x1024xf32>
    %121 = arith.select %120, %118, %76 : vector<2x1024xi1>, vector<2x1024xf32>
    %cst_32 = arith.constant 1.000000e-01 : f32
    %122 = vector.broadcast %cst_32 : f32 to vector<2x1024xf32>
    %123 = arith.mulf %121, %122 : vector<2x1024xf32>
    %c0_33 = arith.constant 0 : index
    %c0_34 = arith.constant 0 : index
    %124 = vector.load %arg2[%c0_33, %c0_34] : memref<2x1024xf32, #tpu.memory_space<vmem>>, vector<2x1024xf32>
    %125 = arith.addf %124, %123 : vector<2x1024xf32>
    %c0_35 = arith.constant 0 : index
    %c0_36 = arith.constant 0 : index
    %126 = vector.load %arg3[%c0_35, %c0_36] : memref<2x1024xf32, #tpu.memory_space<vmem>>, vector<2x1024xf32>
    tpu.vector_store %arg3[%c0_35, %c0_36], %125 {strides = array<i32>} : memref<2x1024xf32, #tpu.memory_space<vmem>>, vector<2x1024xf32>,
    return
  }
  func.func @transform_0(%arg0: i32, %arg1: memref<1xi32, #tpu.memory_space<smem>>) -> (i32, i32) {
    %c0_i32 = arith.constant 0 : i32
    %c0_i32_0 = arith.constant 0 : i32
    return %arg0, %c0_i32 : i32, i32
  }
  func.func @transform_1(%arg0: i32, %arg1: memref<1xi32, #tpu.memory_space<smem>>) -> (i32, i32) {
    %c0_i32 = arith.constant 0 : i32
    %c0_i32_0 = arith.constant 0 : i32
    return %arg0, %c0_i32 : i32, i32
  }
}

</mosaic_0001>

<bundles_post_ra>
// kernel: tpu_custom_call.1
= control target key start
LH: loop header
LB: loop body
LE: loop exit
PB: predicated region body
PF: predicated region fallthrough
CT: control target
= control target key end

     0   :  { %8 = vsyncpa [#allocation5], 0  ;;  %s1463_s0 = inlined_call_operand.<no memory space> [shape: s32[1], index: 0, kind: input, shape index: {}]   ;;  %s1464_s1 = inlined_call_operand.hbm [shape: f32[2,1024], index: 1, kind: input, shape index: {}]   ;;  %s1465_s2 = inlined_call_operand.hbm [shape: f32[2,1024], index: 2, kind: output, shape index: {}]  }
   0x1   :  { %9 = vsyncpa [#allocation6], 0  ;;  %s905_s9 = smov [#allocation4]  }
   0x2   :  { %s16_s10 = sshll.u32 %s905_s9, 4  ;;  %s17_s10 = int_to_ptr.vmem [resolvable:$true] %s16_s10 }
   0x3   :  { %s869_s11 = scalar_lea.vmem %s17_s10, 256  ;;  %p874_p1 = scmp.lt.s32.totalorder %s17_s10, %s17_s10 }
   0x4   :  { %p870_p0 = scmp.ne.s32.totalorder %s17_s10, %s869_s11  ;;  %p875_p2 = scmp.lt.s32.totalorder %s869_s11, %s869_s11 }
   0x6   :  { %p876_p3 = por %p875_p2, %p874_p1 }
   0x8   :  { %p877_p4 = pnand %p876_p3, %p870_p0 }
   0xa   :  { %880 = shalt.err (!%p877_p4)
}
   0xb   :  { %19 = dma.hbm_to_vmem [thread:$0]  %s1464_s1, 256, %s17_s10, [#allocation5]  }
   0xc   :  { %901 = dma.done.wait [#allocation5], 256  }
   0xd   :  { %902 = vsyncadd [#allocation5], 4294967040  ;;  %v24_v0 = vlaneseq  ;;  %s47_s16 = smul.u32 2654435769, %s1463_s0  ;;  %s907_s0 = smov [#allocation7]  }
   0xe   :  { %s745_s1 = sshll.u32 %s907_s0, 4  ;;  %s746_s1 = int_to_ptr.vmem [resolvable:$true] %s745_s1 }
   0xf   :  { %v926_v1 = vshrl.u32 %v24_v0, 7  ;;  %v27_v2 = vand.u32 127, %v24_v0  ;;  %v48_v11 = vstv %s47_s16  ;;  %s881_s17 = scalar_lea.vmem %s746_s1, 256  ;;  %p886_p6 = scmp.lt.s32.totalorder %s746_s1, %s746_s1 }
  0x10   :  { %p882_p5 = scmp.ne.s32.totalorder %s746_s1, %s881_s17  ;;  %p887_p7 = scmp.lt.s32.totalorder %s881_s17, %s881_s17 }
  0x11   :  { %1477 = vst [vmem:[#allocation10_spill] sm:$0xff] %v926_v1  ;;  %v28_v3 = vadd.s32 128, %v27_v2  ;;  %v29_v4 = vadd.s32 256, %v27_v2  ;;  %v30_v5 = vadd.s32 384, %v27_v2  ;;  %v31_v6 = vadd.s32 512, %v27_v2 }
  0x12   :  { %v32_v7 = vadd.s32 640, %v27_v2  ;;  %v33_v8 = vadd.s32 768, %v27_v2  ;;  %v34_v9 = vadd.s32 896, %v27_v2  ;;  %v38_v10 = vmul.u32 1024, %v926_v1  ;;  %p888_p8 = por %p887_p7, %p886_p6 }
  0x14   :  { %v39_v12 = vadd.s32 %v38_v10, %v27_v2  ;;  %v40_v13 = vadd.s32 %v38_v10, %v28_v3  ;;  %v41_v14 = vadd.s32 %v38_v10, %v29_v4  ;;  %v42_v15 = vadd.s32 %v38_v10, %v30_v5  ;;  %p889_p9 = pnand %p888_p8, %p882_p5 }
  0x15   :  { %v43_v16 = vadd.s32 %v38_v10, %v31_v6  ;;  %v44_v17 = vadd.s32 %v38_v10, %v32_v7  ;;  %v45_v18 = vadd.s32 %v38_v10, %v33_v8  ;;  %v46_v19 = vadd.s32 %v38_v10, %v34_v9 }
  0x16   :  { %v49_v20 = vxor.u32 %v48_v11, %v39_v12  ;;  %v50_v21 = vxor.u32 %v48_v11, %v40_v13  ;;  %v51_v22 = vxor.u32 %v48_v11, %v41_v14  ;;  %v52_v23 = vxor.u32 %v48_v11, %v42_v15 }
  0x17   :  { %v53_v24 = vxor.u32 %v48_v11, %v43_v16  ;;  %v54_v25 = vxor.u32 %v48_v11, %v44_v17  ;;  %v55_v27 = vxor.u32 %v48_v11, %v45_v18  ;;  %v56_v28 = vxor.u32 %v48_v11, %v46_v19 }
  0x18   :  { %v754_v26 = vshrl.u32 %v49_v20, 16  ;;  %v755_v29 = vshrl.u32 %v50_v21, 16  ;;  %v756_v30 = vshrl.u32 %v51_v22, 16  ;;  %v757_v31 = vshrl.u32 %v52_v23, 16 }
  0x19   :  { %v758_v32 = vshrl.u32 %v53_v24, 16  ;;  %v759_v33 = vshrl.u32 %v54_v25, 16  ;;  %v760_v35 = vshrl.u32 %v55_v27, 16  ;;  %v761_v36 = vshrl.u32 %v56_v28, 16 }
  0x1a   :  { %v73_v34 = vxor.u32 %v754_v26, %v49_v20  ;;  %v74_v37 = vxor.u32 %v755_v29, %v50_v21  ;;  %v75_v38 = vxor.u32 %v756_v30, %v51_v22  ;;  %v76_v39 = vxor.u32 %v757_v31, %v52_v23 }
  0x1b   :  { %v77_v40 = vxor.u32 %v758_v32, %v53_v24  ;;  %v78_v41 = vxor.u32 %v759_v33, %v54_v25  ;;  %v79_v43 = vxor.u32 %v760_v35, %v55_v27  ;;  %v80_v44 = vxor.u32 %v761_v36, %v56_v28 }
  0x1c   :  { %v81_v42 = vmul.u32 2146121005, %v73_v34  ;;  %v82_v45 = vmul.u32 2146121005, %v74_v37 }
  0x1d   :  { %v83_v46 = vmul.u32 2146121005, %v75_v38  ;;  %v84_v47 = vmul.u32 2146121005, %v76_v39 }
  0x1e   :  { %v85_v48 = vmul.u32 2146121005, %v77_v40  ;;  %v86_v49 = vmul.u32 2146121005, %v78_v41  ;;  %v762_v50 = vshrl.u32 %v81_v42, 15  ;;  %v763_v53 = vshrl.u32 %v82_v45, 15 }
  0x1f   :  { %v87_v51 = vmul.u32 2146121005, %v79_v43  ;;  %v88_v52 = vmul.u32 2146121005, %v80_v44  ;;  %v764_v54 = vshrl.u32 %v83_v46, 15  ;;  %v765_v55 = vshrl.u32 %v84_v47, 15 }
  0x20   :  { %v766_v56 = vshrl.u32 %v85_v48, 15  ;;  %v767_v57 = vshrl.u32 %v86_v49, 15  ;;  %v105_v58 = vxor.u32 %v762_v50, %v81_v42  ;;  %v106_v61 = vxor.u32 %v763_v53, %v82_v45 }
  0x21   :  { %v768_v59 = vshrl.u32 %v87_v51, 15  ;;  %v769_v60 = vshrl.u32 %v88_v52, 15  ;;  %v107_v62 = vxor.u32 %v764_v54, %v83_v46  ;;  %v108_v63 = vxor.u32 %v765_v55, %v84_v47 }
  0x22   :  { %v109_v0 = vxor.u32 %v766_v56, %v85_v48  ;;  %v110_v2 = vxor.u32 %v767_v57, %v86_v49  ;;  %v113_v3 = vmul.u32 2221565579, %v105_v58  ;;  %v114_v6 = vmul.u32 2221565579, %v106_v61 }
  0x23   :  { %v111_v4 = vxor.u32 %v768_v59, %v87_v51  ;;  %v112_v5 = vxor.u32 %v769_v60, %v88_v52  ;;  %v115_v7 = vmul.u32 2221565579, %v107_v62  ;;  %v116_v8 = vmul.u32 2221565579, %v108_v63 }
  0x24   :  { %v117_v9 = vmul.u32 2221565579, %v109_v0  ;;  %v118_v10 = vmul.u32 2221565579, %v110_v2  ;;  %v770_v11 = vshrl.u32 %v113_v3, 16  ;;  %v771_v14 = vshrl.u32 %v114_v6, 16 }
  0x25   :  { %v119_v12 = vmul.u32 2221565579, %v111_v4  ;;  %v120_v13 = vmul.u32 2221565579, %v112_v5  ;;  %v772_v15 = vshrl.u32 %v115_v7, 16  ;;  %v773_v16 = vshrl.u32 %v116_v8, 16 }
  0x26   :  { %v774_v17 = vshrl.u32 %v117_v9, 16  ;;  %v775_v18 = vshrl.u32 %v118_v10, 16  ;;  %v137_v19 = vxor.u32 %v770_v11, %v113_v3  ;;  %v138_v22 = vxor.u32 %v771_v14, %v114_v6 }
  0x27   :  { %v776_v20 = vshrl.u32 %v119_v12, 16  ;;  %v777_v21 = vshrl.u32 %v120_v13, 16  ;;  %v139_v23 = vxor.u32 %v772_v15, %v115_v7  ;;  %v140_v24 = vxor.u32 %v773_v16, %v116_v8 }
  0x28   :  { %v141_v25 = vxor.u32 %v774_v17, %v117_v9  ;;  %v142_v26 = vxor.u32 %v775_v18, %v118_v10  ;;  %v778_v27 = vshrl.u32 %v137_v19, 8  ;;  %v779_v30 = vshrl.u32 %v138_v22, 8 }
  0x29   :  { %v143_v28 = vxor.u32 %v776_v20, %v119_v12  ;;  %v144_v29 = vxor.u32 %v777_v21, %v120_v13  ;;  %v780_v31 = vshrl.u32 %v139_v23, 8  ;;  %v781_v32 = vshrl.u32 %v140_v24, 8 }
  0x2a   :  { %v782_v33 = vshrl.u32 %v141_v25, 8  ;;  %v783_v34 = vshrl.u32 %v142_v26, 8  ;;  %v161_v35 = vcvt.s32.f32 %v778_v27  ;;  %v162_v38 = vcvt.s32.f32 %v779_v30 }
  0x2b   :  { %v784_v36 = vshrl.u32 %v143_v28, 8  ;;  %v785_v37 = vshrl.u32 %v144_v29, 8  ;;  %v163_v39 = vcvt.s32.f32 %v780_v31  ;;  %v164_v40 = vcvt.s32.f32 %v781_v32 }
  0x2c   :  { %v165_v41 = vcvt.s32.f32 %v782_v33  ;;  %v166_v42 = vcvt.s32.f32 %v783_v34  ;;  %v169_v43 = vadd.f32 0.5, %v161_v35  ;;  %v170_v46 = vadd.f32 0.5, %v162_v38 }
  0x2d   :  { %v167_v44 = vcvt.s32.f32 %v784_v36  ;;  %v168_v45 = vcvt.s32.f32 %v785_v37  ;;  %v171_v47 = vadd.f32 0.5, %v163_v39  ;;  %v172_v48 = vadd.f32 0.5, %v164_v40 }
  0x2e   :  { %v173_v49 = vadd.f32 0.5, %v165_v41  ;;  %v174_v50 = vadd.f32 0.5, %v166_v42  ;;  %v932_v51 = vmul.f32 5.9604645e-08, %v169_v43  ;;  %v934_v54 = vmul.f32 5.9604645e-08, %v170_v46 }
  0x2f   :  { %v175_v52 = vadd.f32 0.5, %v167_v44  ;;  %v176_v53 = vadd.f32 0.5, %v168_v45  ;;  %v936_v55 = vmul.f32 5.9604645e-08, %v171_v47  ;;  %v941_v57 = vmul.f32 5.9604645e-08, %v172_v48 }
  0x30   :  { %v939_v56 = vadd.f32 -0.5, %v932_v51  ;;  %v943_v58 = vmul.f32 5.9604645e-08, %v173_v49  ;;  %v945_v59 = vmul.f32 5.9604645e-08, %v174_v50  ;;  %v948_v60 = vadd.f32 -0.5, %v934_v54 }
  0x31   :  { %v951_v61 = vadd.f32 -0.5, %v936_v55  ;;  %v953_v62 = vmul.f32 5.9604645e-08, %v175_v52  ;;  %v955_v63 = vmul.f32 5.9604645e-08, %v176_v53  ;;  %v958_v0 = vadd.f32 -0.5, %v941_v57 }
  0x32   :  { %v961_v2 = vadd.f32 -0.5, %v943_v58  ;;  %v964_v3 = vadd.f32 -0.5, %v945_v59  ;;  %v968_v4 = vmul.f32 %v939_v56, %v939_v56  ;;  %v978_v7 = vmul.f32 %v948_v60, %v948_v60 }
  0x33   :  { %1478 = vst [vmem:[#allocation11_spill] sm:$0xff] %v953_v62  ;;  %1479 = vst [vmem:[#allocation12_spill] sm:$0xff] %v955_v63  ;;  %v971_v5 = vadd.f32 -0.5, %v953_v62  ;;  %v974_v6 = vadd.f32 -0.5, %v955_v63  ;;  %v982_v8 = vmul.f32 %v951_v61, %v951_v61  ;;  %v987_v10 = vmul.f32 %v958_v0, %v958_v0 }
  0x34   :  { %v201_v9 = vmul.f32 -39.69683, %v968_v4  ;;  %v991_v11 = vmul.f32 %v961_v2, %v961_v2  ;;  %v995_v12 = vmul.f32 %v964_v3, %v964_v3  ;;  %v202_v13 = vmul.f32 -39.69683, %v978_v7 }
  0x35   :  { %v203_v14 = vmul.f32 -39.69683, %v982_v8  ;;  %v1001_v15 = vmul.f32 %v971_v5, %v971_v5  ;;  %v1005_v16 = vmul.f32 %v974_v6, %v974_v6  ;;  %v204_v17 = vmul.f32 -39.69683, %v987_v10 }
  0x36   :  { %v205_v18 = vmul.f32 -39.69683, %v991_v11  ;;  %v206_v19 = vmul.f32 -39.69683, %v995_v12  ;;  %v209_v20 = vadd.f32 220.9461, %v201_v9 }
  0x37   :  { %v207_v21 = vmul.f32 -39.69683, %v1001_v15  ;;  %v208_v22 = vmul.f32 -39.69683, %v1005_v16  ;;  %v210_v23 = vadd.f32 220.9461, %v202_v13 }
  0x38   :  { %v211_v24 = vadd.f32 220.9461, %v203_v14  ;;  %v212_v25 = vadd.f32 220.9461, %v204_v17  ;;  %v213_v26 = vadd.f32 220.9461, %v205_v18  ;;  %v217_v28 = vmul.f32 %v209_v20, %v968_v4 }
  0x39   :  { %v214_v27 = vadd.f32 220.9461, %v206_v19  ;;  %v215_v29 = vadd.f32 220.9461, %v207_v21  ;;  %v216_v30 = vadd.f32 220.9461, %v208_v22  ;;  %v218_v31 = vmul.f32 %v210_v23, %v978_v7 }
  0x3a   :  { %v219_v32 = vmul.f32 %v211_v24, %v982_v8  ;;  %v220_v33 = vmul.f32 %v212_v25, %v987_v10  ;;  %v221_v34 = vmul.f32 %v213_v26, %v991_v11  ;;  %v225_v36 = vadd.f32 -275.9285, %v217_v28 }
  0x3b   :  { %v222_v35 = vmul.f32 %v214_v27, %v995_v12  ;;  %v223_v37 = vmul.f32 %v215_v29, %v1001_v15  ;;  %v224_v38 = vmul.f32 %v216_v30, %v1005_v16  ;;  %v226_v39 = vadd.f32 -275.9285, %v218_v31 }
  0x3c   :  { %v227_v40 = vadd.f32 -275.9285, %v219_v32  ;;  %v228_v41 = vadd.f32 -275.9285, %v220_v33  ;;  %v229_v42 = vadd.f32 -275.9285, %v221_v34  ;;  %v233_v44 = vmul.f32 %v225_v36, %v968_v4 }
  0x3d   :  { %v230_v43 = vadd.f32 -275.9285, %v222_v35  ;;  %v231_v45 = vadd.f32 -275.9285, %v223_v37  ;;  %v232_v46 = vadd.f32 -275.9285, %v224_v38  ;;  %v234_v47 = vmul.f32 %v226_v39, %v978_v7 }
  0x3e   :  { %v235_v48 = vmul.f32 %v227_v40, %v982_v8  ;;  %v236_v49 = vmul.f32 %v228_v41, %v987_v10  ;;  %v237_v50 = vmul.f32 %v229_v42, %v991_v11  ;;  %v241_v53 = vadd.f32 138.35776, %v233_v44 }
  0x3f   :  { %v238_v52 = vmul.f32 %v230_v43, %v995_v12  ;;  %v239_v9 = vmul.f32 %v231_v45, %v1001_v15  ;;  %v240_v13 = vmul.f32 %v232_v46, %v1005_v16  ;;  %v385_v14 = vsub.f32 1.0, %v932_v51 }
  0x40   :  { %v386_v17 = vsub.f32 1.0, %v934_v54  ;;  %v242_v18 = vadd.f32 138.35776, %v234_v47  ;;  %v243_v19 = vadd.f32 138.35776, %v235_v48  ;;  %v387_v20 = vsub.f32 1.0, %v936_v55 }
  0x41   :  { %v244_v21 = vadd.f32 138.35776, %v236_v49  ;;  %v245_v22 = vadd.f32 138.35776, %v237_v50  ;;  %v388_v23 = vsub.f32 1.0, %v941_v57  ;;  %v249_v25 = vmul.f32 %v241_v53, %v968_v4 }
  0x42   :  { %v246_v24 = vadd.f32 138.35776, %v238_v52  ;;  %v389_v26 = vsub.f32 1.0, %v943_v58  ;;  %v1035_v27 = vmin.f32 %v932_v51, %v385_v14  ;;  %v247_v28 = vadd.f32 138.35776, %v239_v9 }
  0x43   :  { %v248_v29 = vadd.f32 138.35776, %v240_v13  ;;  %v390_v30 = vsub.f32 1.0, %v945_v59  ;;  %v1039_v31 = vmin.f32 %v934_v54, %v386_v17  ;;  %v250_v32 = vmul.f32 %v242_v18, %v978_v7 }
  0x44   :  { %v251_v33 = vmul.f32 %v243_v19, %v982_v8  ;;  %v391_v34 = vsub.f32 1.0, %v953_v62  ;;  %v1045_v35 = vmin.f32 %v936_v55, %v387_v20  ;;  %v252_v36 = vmul.f32 %v244_v21, %v987_v10 }
  0x45   :  { %v253_v37 = vmul.f32 %v245_v22, %v991_v11  ;;  %v392_v38 = vsub.f32 1.0, %v955_v63  ;;  %v1051_v39 = vmin.f32 %v941_v57, %v388_v23  ;;  %v254_v40 = vmul.f32 %v246_v24, %v995_v12 }
  0x46   :  { %v257_v41 = vadd.f32 -30.664799, %v249_v25  ;;  %v1055_v42 = vmin.f32 %v943_v58, %v389_v26  ;;  %797 = vlog2.f32 %v1035_v27  ;;  %v289_v43 = vmul.f32 -54.476097, %v968_v4 }
  0x47   :  { %v290_v44 = vmul.f32 -54.476097, %v978_v7  ;;  %v1061_v45 = vmin.f32 %v945_v59, %v390_v30  ;;  %799 = vlog2.f32 %v1039_v31  ;;  %v291_v46 = vmul.f32 -54.476097, %v982_v8 }
  0x48   :  { %v292_v47 = vmul.f32 -54.476097, %v987_v10  ;;  %v1067_v48 = vmin.f32 %v953_v62, %v391_v34  ;;  %801 = vlog2.f32 %v1045_v35  ;;  %v293_v49 = vmul.f32 -54.476097, %v991_v11 }
  0x49   :  { %1480 = vst [vmem:[#allocation13_spill] sm:$0xff] %v1061_v45  ;;  %v294_v50 = vmul.f32 -54.476097, %v995_v12  ;;  %v1073_v52 = vmin.f32 %v955_v63, %v392_v38  ;;  %803 = vlog2.f32 %v1051_v39  ;;  %v255_v53 = vmul.f32 %v247_v28, %v1001_v15 }
  0x4a   :  { %1481 = vst [vmem:[#allocation14_spill] sm:$0xff] %v1067_v48  ;;  %v256_v9 = vmul.f32 %v248_v29, %v1005_v16  ;;  %v295_v13 = vmul.f32 -54.476097, %v1001_v15  ;;  %805 = vlog2.f32 %v1055_v42  ;;  %v258_v14 = vadd.f32 -30.664799, %v250_v32 }
  0x4b   :  { %1482 = vst [vmem:[#allocation15_spill] sm:$0xff] %v1073_v52  ;;  %v297_v17 = vadd.f32 161.58583, %v289_v43  ;;  %v298_v18 = vadd.f32 161.58583, %v290_v44  ;;  %807 = vlog2.f32 %v1061_v45  ;;  %v265_v28 = vmul.f32 %v257_v41, %v968_v4 }
  0x4c   :  { %v259_v19 = vadd.f32 -30.664799, %v251_v33  ;;  %v299_v20 = vadd.f32 161.58583, %v291_v46  ;;  %v300_v21 = vadd.f32 161.58583, %v292_v47  ;;  %809 = vlog2.f32 %v1067_v48 }
  0x4d   :  { %v296_v22 = vmul.f32 -54.476097, %v1005_v16  ;;  %v301_v23 = vadd.f32 161.58583, %v293_v49  ;;  %v302_v24 = vadd.f32 161.58583, %v294_v50  ;;  %811 = vlog2.f32 %v1073_v52 }
  0x4e   :  { %v260_v25 = vadd.f32 -30.664799, %v252_v36  ;;  %v261_v26 = vadd.f32 -30.664799, %v253_v37  ;;  %v303_v29 = vadd.f32 161.58583, %v295_v13  ;;  %v266_v32 = vmul.f32 %v258_v14, %v978_v7 }
  0x4f   :  { %v262_v30 = vadd.f32 -30.664799, %v254_v40  ;;  %v305_v33 = vmul.f32 %v297_v17, %v968_v4  ;;  %v306_v34 = vmul.f32 %v298_v18, %v978_v7  ;;  %v263_v38 = vadd.f32 -30.664799, %v255_v53 }
  0x50   :  { %v264_v43 = vadd.f32 -30.664799, %v256_v9  ;;  %v307_v44 = vmul.f32 %v299_v20, %v982_v8  ;;  %v308_v46 = vmul.f32 %v300_v21, %v987_v10  ;;  %v267_v47 = vmul.f32 %v259_v19, %v982_v8 }
  0x51   :  { %v304_v36 = vadd.f32 161.58583, %v296_v22  ;;  %v309_v37 = vmul.f32 %v301_v23, %v991_v11  ;;  %v310_v41 = vmul.f32 %v302_v24, %v995_v12  ;;  %v268_v40 = vmul.f32 %v260_v25, %v987_v10 }
  0x52   :  { %v269_v49 = vmul.f32 %v261_v26, %v991_v11  ;;  %v1095_v50 = vadd.f32 2.5066283, %v265_v28  ;;  %v311_v53 = vmul.f32 %v303_v29, %v1001_v15  ;;  %v270_v13 = vmul.f32 %v262_v30, %v995_v12 }
  0x53   :  { %v798_v9 = vpop.eup %797  ;;  %v1099_v14 = vadd.f32 2.5066283, %v266_v32  ;;  %v313_v17 = vadd.f32 -155.69897, %v305_v33  ;;  %v314_v18 = vadd.f32 -155.69897, %v306_v34  ;;  %v271_v20 = vmul.f32 %v263_v38, %v1001_v15 }
  0x54   :  { %v800_v19 = vpop.eup %799  ;;  %v315_v21 = vadd.f32 -155.69897, %v307_v44  ;;  %v316_v22 = vadd.f32 -155.69897, %v308_v46  ;;  %v402_v23 = vmul.f32 0.6931472, %v798_v9  ;;  %v312_v25 = vmul.f32 %v304_v36, %v1005_v16 }
  0x55   :  { %v802_v24 = vpop.eup %801  ;;  %v317_v26 = vadd.f32 -155.69897, %v309_v37  ;;  %v318_v28 = vadd.f32 -155.69897, %v310_v41  ;;  %v404_v1 = vmul.f32 0.6931472, %v800_v19  ;;  %v272_v52 = vmul.f32 %v264_v43, %v1005_v16 }
  0x56   :  { %v804_v29 = vpop.eup %803  ;;  %v319_v30 = vadd.f32 -155.69897, %v311_v53  ;;  %v406_v32 = vmul.f32 0.6931472, %v802_v24  ;;  %v1104_v48 = vmul.f32 -2.0, %v402_v23  ;;  %v321_v34 = vmul.f32 %v313_v17, %v968_v4 }
  0x57   :  { %v806_v33 = vpop.eup %805  ;;  %v322_v38 = vmul.f32 %v314_v18, %v978_v7  ;;  %v408_v44 = vmul.f32 0.6931472, %v804_v29  ;;  %v1108_v46 = vmul.f32 -2.0, %v404_v1  ;;  %v323_v36 = vmul.f32 %v315_v21, %v982_v8 }
  0x58   :  { %v808_v9 = vpop.eup %807  ;;  %v410_v37 = vmul.f32 0.6931472, %v806_v33  ;;  %v1111_v41 = vmul.f32 -2.0, %v406_v32  ;;  %813 = vrsqrt.f32 %v1104_v48  ;;  %v320_v53 = vadd.f32 -155.69897, %v312_v25 }
  0x59   :  { %v810_v43 = vpop.eup %809  ;;  %v324_v19 = vmul.f32 %v316_v22, %v987_v10  ;;  %v412_v23 = vmul.f32 0.6931472, %v808_v9  ;;  %v1115_v24 = vmul.f32 -2.0, %v408_v44  ;;  %v325_v18 = vmul.f32 %v317_v26, %v991_v11 }
  0x5a   :  { %v812_v17 = vpop.eup %811  ;;  %v414_v1 = vmul.f32 0.6931472, %v810_v43  ;;  %v1118_v29 = vmul.f32 -2.0, %v410_v37  ;;  %815 = vrsqrt.f32 %v1108_v46  ;;  %v326_v21 = vmul.f32 %v318_v28, %v995_v12 }
  0x5b   :  { %v329_v32 = vadd.f32 66.801315, %v321_v34  ;;  %v416_v33 = vmul.f32 0.6931472, %v812_v17  ;;  %v1122_v63 = vmul.f32 -2.0, %v412_v23  ;;  %817 = vrsqrt.f32 %v1111_v41 }
  0x5c   :  { %v330_v25 = vadd.f32 66.801315, %v322_v38  ;;  %v331_v45 = vadd.f32 66.801315, %v323_v36  ;;  %v1124_v22 = vmul.f32 -2.0, %v414_v1  ;;  %819 = vrsqrt.f32 %v1115_v24 }
  0x5d   :  { %v275_v44 = vadd.f32 2.5066283, %v267_v47  ;;  %v276_v9 = vadd.f32 2.5066283, %v268_v40  ;;  %v1127_v26 = vmul.f32 -2.0, %v416_v33  ;;  %v327_v28 = vmul.f32 %v319_v30, %v1001_v15 }
  0x5e   :  { %v1130_v37 = vadd.f32 2.5066283, %v269_v49  ;;  %v328_v34 = vmul.f32 %v320_v53, %v1005_v16  ;;  %821 = vrsqrt.f32 %v1118_v29  ;;  %v332_v38 = vadd.f32 66.801315, %v324_v19 }
  0x5f   :  { %v333_v36 = vadd.f32 66.801315, %v325_v18  ;;  %v334_v43 = vadd.f32 66.801315, %v326_v21  ;;  %823 = vrsqrt.f32 %v1122_v63  ;;  %v337_v47 = vmul.f32 %v329_v32, %v968_v4 }
  0x60   :  { %v338_v40 = vmul.f32 %v330_v25, %v978_v7  ;;  %v339_v23 = vmul.f32 %v331_v45, %v982_v8  ;;  %825 = vrsqrt.f32 %v1124_v22  ;;  %v1140_v49 = vadd.f32 2.5066283, %v270_v13 }
  0x61   :  { %v1142_v30 = vadd.f32 2.5066283, %v271_v20  ;;  %v1146_v53 = vmul.f32 %v939_v56, %v1095_v50  ;;  %827 = vrsqrt.f32 %v1127_v26  ;;  %v1149_v19 = vadd.f32 2.5066283, %v272_v52 }
  0x62   :  { %v1153_v17 = vmul.f32 %v948_v60, %v1099_v14  ;;  %v1156_v45 = vmul.f32 %v951_v61, %v275_v44  ;;  %v1159_v13 = vmul.f32 %v958_v0, %v276_v9  ;;  %v1161_v20 = vadd.f32 66.801315, %v327_v28 }
  0x63   :  { %v1163_v18 = vadd.f32 66.801315, %v328_v34  ;;  %v1166_v56 = vmul.f32 %v332_v38, %v987_v10  ;;  %v1169_v52 = vmul.f32 %v333_v36, %v991_v11  ;;  %v1172_v50 = vmul.f32 %v334_v43, %v995_v12 }
  0x64   :  { %1483 = vst [vmem:[#allocation16_spill] sm:$0xff] %v1153_v17  ;;  %1484 = vst [vmem:[#allocation17_spill] sm:$0xff] %v1156_v45  ;;  %v1174_v60 = vadd.f32 -13.280682, %v337_v47  ;;  %v1176_v61 = vadd.f32 -13.280682, %v338_v40 }
  0x65   :  { %1485 = vst [vmem:[#allocation18_spill] sm:$0xff] %v1159_v13  ;;  %v1178_v14 = vadd.f32 -13.280682, %v339_v23  ;;  %v814_v0 = vpop.eup %813  ;;  %vm427_vm0 = vcmp.eq.f32.partialorder %v1104_v48, inf  ;;  %vm429_vm1 = vcmp.eq.f32.partialorder %v1104_v48, 0.0  ;;  %v430_v1 = vand.u32 2147483648, %v1104_v48 }
  0x66   :  { %vm434_vm2 = vcmp.eq.f32.partialorder %v1108_v46, inf  ;;  %v426_v21 = vmul.f32 %v814_v0, %v1104_v48  ;;  %vm436_vm3 = vcmp.eq.f32.partialorder %v1108_v46, 0.0  ;;  %v437_v32 = vand.u32 2147483648, %v1108_v46 }
  0x67   :  { %vm441_vm4 = vcmp.eq.f32.partialorder %v1111_v41, inf  ;;  %v816_v33 = vpop.eup %815  ;;  %vm443_vm5 = vcmp.eq.f32.partialorder %v1111_v41, 0.0  ;;  %v444_v25 = vand.u32 2147483648, %v1111_v41  ;;  %vm448_vm6 = vcmp.eq.f32.partialorder %v1115_v24, inf }
  0x68   :  { %vm450_vm7 = vcmp.eq.f32.partialorder %v1115_v24, 0.0  ;;  %v428_v44 = vsel %vm427_vm0, %v1104_v48, %v426_v21  ;;  %v433_v9 = vmul.f32 %v816_v33, %v1108_v46  ;;  %v451_v28 = vand.u32 2147483648, %v1115_v24  ;;  %v818_v34 = vpop.eup %817 }
  0x69   :  { %vm455_vm8 = vcmp.eq.f32.partialorder %v1118_v29, inf  ;;  %vm457_vm9 = vcmp.eq.f32.partialorder %v1118_v29, 0.0  ;;  %v458_v38 = vand.u32 2147483648, %v1118_v29  ;;  %vm462_vm10 = vcmp.eq.f32.partialorder %v1122_v63, inf  ;;  %v820_v36 = vpop.eup %819 }
  0x6a   :  { %vm464_vm11 = vcmp.eq.f32.partialorder %v1122_v63, 0.0  ;;  %v435_v43 = vsel %vm434_vm2, %v1108_v46, %v433_v9  ;;  %v440_v47 = vmul.f32 %v818_v34, %v1111_v41  ;;  %v465_v40 = vand.u32 2147483648, %v1122_v63 }
  0x6b   :  { %vm469_vm12 = vcmp.eq.f32.partialorder %v1124_v22, inf  ;;  %v822_v23 = vpop.eup %821  ;;  %v1208_v0 = vsel %vm429_vm1, %v430_v1, %v428_v44  ;;  %v447_v21 = vmul.f32 %v820_v36, %v1115_v24  ;;  %vm471_vm13 = vcmp.eq.f32.partialorder %v1124_v22, 0.0 }
  0x6c   :  { %vm476_vm14 = vcmp.eq.f32.partialorder %v1127_v26, inf  ;;  %v824_v33 = vpop.eup %823  ;;  %v1215_v9 = vsel %vm436_vm3, %v437_v32, %v435_v43  ;;  %v442_v34 = vsel %vm441_vm4, %v1111_v41, %v440_v47  ;;  %v454_v13 = vmul.f32 %v822_v23, %v1118_v29 }
  0x6d   :  { %v481_v48 = vmul.f32 -0.007784894, %v1208_v0  ;;  %v826_v1 = vpop.eup %825  ;;  %v1224_v44 = vsel %vm443_vm5, %v444_v25, %v442_v34  ;;  %v449_v36 = vsel %vm448_vm6, %v1115_v24, %v447_v21  ;;  %v461_v46 = vmul.f32 %v824_v33, %v1122_v63 }
  0x6e   :  { %v482_v32 = vmul.f32 -0.007784894, %v1215_v9  ;;  %v828_v43 = vpop.eup %827  ;;  %v1233_v47 = vsel %vm450_vm7, %v451_v28, %v449_v36  ;;  %v456_v23 = vsel %vm455_vm8, %v1118_v29, %v454_v13  ;;  %v468_v41 = vmul.f32 %v826_v1, %v1124_v22 }
  0x6f   :  { %v483_v25 = vmul.f32 -0.007784894, %v1224_v44  ;;  %v1242_v21 = vsel %vm457_vm9, %v458_v38, %v456_v23  ;;  %v463_v33 = vsel %vm462_vm10, %v1122_v63, %v461_v46  ;;  %v475_v24 = vmul.f32 %v828_v43, %v1127_v26 }
  0x70   :  { %v484_v28 = vmul.f32 -0.007784894, %v1233_v47  ;;  %v1251_v34 = vsel %vm464_vm11, %v465_v40, %v463_v33  ;;  %v472_v13 = vand.u32 2147483648, %v1124_v22  ;;  %v479_v1 = vand.u32 2147483648, %v1127_v26 }
  0x71   :  { %v485_v29 = vmul.f32 -0.007784894, %v1242_v21  ;;  %v470_v38 = vsel %vm469_vm12, %v1124_v22, %v468_v41  ;;  %v477_v36 = vsel %vm476_vm14, %v1127_v26, %v475_v24  ;;  %vm478_vm15 = vcmp.eq.f32.partialorder %v1127_v26, 0.0 }
  0x72   :  { %v486_v63 = vmul.f32 -0.007784894, %v1251_v34  ;;  %v343_v40 = vmul.f32 %v1161_v20, %v1001_v15  ;;  %v489_v46 = vadd.f32 -0.32239646, %v481_v48  ;;  %v490_v43 = vadd.f32 -0.32239646, %v482_v32 }
  0x73   :  { %v491_v23 = vadd.f32 -0.32239646, %v483_v25  ;;  %v344_v33 = vmul.f32 %v1163_v18, %v1005_v16  ;;  %v348_v45 = vadd.f32 -13.280682, %v1166_v56  ;;  %v349_v41 = vadd.f32 -13.280682, %v1169_v52 }
  0x74   :  { %v492_v62 = vadd.f32 -0.32239646, %v484_v28  ;;  %v353_v24 = vmul.f32 %v1174_v60, %v968_v4  ;;  %v1274_v26 = vsel %vm471_vm13, %v472_v13, %v470_v38  ;;  %v1276_v17 = vsel %vm478_vm15, %v479_v1, %v477_v36 }
  0x75   :  { %v493_v20 = vadd.f32 -0.32239646, %v485_v29  ;;  %v354_v48 = vmul.f32 %v1176_v61, %v978_v7  ;;  %v487_v18 = vmul.f32 -0.007784894, %v1274_v26  ;;  %v488_v56 = vmul.f32 -0.007784894, %v1276_v17 }
  0x76   :  { %v494_v32 = vadd.f32 -0.32239646, %v486_v63  ;;  %v350_v52 = vadd.f32 -13.280682, %v1172_v50  ;;  %v497_v25 = vmul.f32 %v489_v46, %v1208_v0  ;;  %v498_v4 = vmul.f32 %v490_v43, %v1215_v9 }
  0x77   :  { %v499_v22 = vmul.f32 %v491_v23, %v1224_v44  ;;  %v351_v60 = vadd.f32 -13.280682, %v343_v40  ;;  %v352_v28 = vadd.f32 -13.280682, %v344_v33  ;;  %v355_v13 = vmul.f32 %v1178_v14, %v982_v8 }
  0x78   :  { %v500_v7 = vmul.f32 %v492_v62, %v1233_v47  ;;  %v356_v61 = vmul.f32 %v348_v45, %v987_v10  ;;  %v357_v1 = vmul.f32 %v349_v41, %v991_v11  ;;  %v361_v29 = vadd.f32 1.0, %v353_v24 }
  0x79   :  { %v501_v50 = vmul.f32 %v493_v20, %v1242_v21  ;;  %v362_v38 = vadd.f32 1.0, %v354_v48  ;;  %v495_v36 = vadd.f32 -0.32239646, %v487_v18  ;;  %v496_v63 = vadd.f32 -0.32239646, %v488_v56 }
  0x7a   :  { %v502_v46 = vmul.f32 %v494_v32, %v1251_v34  ;;  %v1295_v40 = vmul.f32 %v961_v2, %v1130_v37  ;;  %v505_v43 = vadd.f32 -2.4007583, %v497_v25  ;;  %v506_v8 = vadd.f32 -2.4007583, %v498_v4 }
  0x7b   :  { %v507_v14 = vadd.f32 -2.4007583, %v499_v22  ;;  %v358_v62 = vmul.f32 %v350_v52, %v995_v12  ;;  %v359_v10 = vmul.f32 %v351_v60, %v1001_v15  ;;  %v363_v11 = vadd.f32 1.0, %v355_v13 }
  0x7c   :  { %v508_v45 = vadd.f32 -2.4007583, %v500_v7  ;;  %v360_v23 = vmul.f32 %v352_v28, %v1005_v16  ;;  %v364_v33 = vadd.f32 1.0, %v356_v61  ;;  %v365_v41 = vadd.f32 1.0, %v357_v1 }
  0x7d   :  { %v509_v24 = vadd.f32 -2.4007583, %v501_v50  ;;  %829 = vrcp.f32 %v361_v29  ;;  %v503_v20 = vmul.f32 %v495_v36, %v1274_v26  ;;  %v504_v2 = vmul.f32 %v496_v63, %v1276_v17 }
  0x7e   :  { %v510_v37 = vadd.f32 -2.4007583, %v502_v46  ;;  %831 = vrcp.f32 %v362_v38  ;;  %v513_v48 = vmul.f32 %v505_v43, %v1208_v0  ;;  %v514_v12 = vmul.f32 %v506_v8, %v1215_v9 }
  0x7f   :  { %v515_v15 = vmul.f32 %v507_v14, %v1224_v44  ;;  %v366_v18 = vadd.f32 1.0, %v358_v62  ;;  %v367_v56 = vadd.f32 1.0, %v359_v10  ;;  %833 = vrcp.f32 %v363_v11 }
  0x80   :  { %v516_v16 = vmul.f32 %v508_v45, %v1233_v47  ;;  %v368_v32 = vadd.f32 1.0, %v360_v23  ;;  %835 = vrcp.f32 %v364_v33  ;;  %v517_v52 = vmul.f32 %v509_v24, %v1242_v21 }
  0x81   :  { %v561_v25 = vmul.f32 0.007784696, %v1208_v0  ;;  %v511_v4 = vadd.f32 -2.4007583, %v503_v20  ;;  %v512_v22 = vadd.f32 -2.4007583, %v504_v2  ;;  %v518_v60 = vmul.f32 %v510_v37, %v1251_v34 }
  0x82   :  { %v562_v28 = vmul.f32 0.007784696, %v1215_v9  ;;  %837 = vrcp.f32 %v365_v41  ;;  %v521_v13 = vadd.f32 -2.5497324, %v513_v48  ;;  %v522_v7 = vadd.f32 -2.5497324, %v514_v12 }
  0x83   :  { %v1310_v61 = vadd.f32 -2.5497324, %v515_v15  ;;  %839 = vrcp.f32 %v366_v18  ;;  %v1312_v1 = vadd.f32 -2.5497324, %v516_v16  ;;  %v563_v29 = vmul.f32 0.007784696, %v1224_v44 }
  0x84   :  { %v564_v50 = vmul.f32 0.007784696, %v1233_v47  ;;  %841 = vrcp.f32 %v367_v56  ;;  %v1316_v38 = vadd.f32 -2.5497324, %v517_v52  ;;  %v565_v36 = vmul.f32 0.007784696, %v1242_v21 }
  0x85   :  { %v566_v63 = vmul.f32 0.007784696, %v1251_v34  ;;  %843 = vrcp.f32 %v368_v32  ;;  %v1320_v46 = vadd.f32 -2.5497324, %v518_v60  ;;  %v567_v43 = vmul.f32 0.007784696, %v1274_v26 }
  0x86   :  { %v568_v8 = vmul.f32 0.007784696, %v1276_v17  ;;  %v1325_v14 = vmul.f32 %v511_v4, %v1274_v26  ;;  %v569_v62 = vadd.f32 0.32246712, %v561_v25  ;;  %v570_v10 = vadd.f32 0.32246712, %v562_v28 }
  0x87   :  { %v571_v11 = vadd.f32 0.32246712, %v563_v29  ;;  %v1328_v45 = vmul.f32 %v512_v22, %v1276_v17  ;;  %v572_v23 = vadd.f32 0.32246712, %v564_v50  ;;  %v573_v33 = vadd.f32 0.32246712, %v565_v36 }
  0x88   :  { %v574_v41 = vadd.f32 0.32246712, %v566_v63  ;;  %v575_v24 = vadd.f32 0.32246712, %v567_v43  ;;  %v576_v20 = vadd.f32 0.32246712, %v568_v8  ;;  %v577_v2 = vmul.f32 %v569_v62, %v1208_v0 }
  0x89   :  { %v578_v37 = vmul.f32 %v570_v10, %v1215_v9  ;;  %v579_v48 = vmul.f32 %v571_v11, %v1224_v44  ;;  %v580_v12 = vmul.f32 %v572_v23, %v1233_v47  ;;  %v581_v15 = vmul.f32 %v573_v33, %v1242_v21 }
  0x8a   :  { %v582_v18 = vmul.f32 %v574_v41, %v1251_v34  ;;  %v1336_v56 = vpop.eup %829  ;;  %v583_v16 = vmul.f32 %v575_v24, %v1274_v26  ;;  %v584_v32 = vmul.f32 %v576_v20, %v1276_v17  ;;  %v585_v52 = vadd.f32 2.4451342, %v577_v2 }
  0x8b   :  { %v586_v25 = vadd.f32 2.4451342, %v578_v37  ;;  %v1340_v4 = vpop.eup %831  ;;  %v529_v22 = vmul.f32 %v521_v13, %v1208_v0  ;;  %v587_v60 = vadd.f32 2.4451342, %v579_v48  ;;  %v588_v28 = vadd.f32 2.4451342, %v580_v12 }
  0x8c   :  { %v589_v29 = vadd.f32 2.4451342, %v581_v15  ;;  %v1343_v50 = vpop.eup %833  ;;  %v590_v36 = vadd.f32 2.4451342, %v582_v18  ;;  %v591_v63 = vadd.f32 2.4451342, %v583_v16  ;;  %v593_v8 = vmul.f32 %v585_v52, %v1208_v0 }
  0x8d   :  { %v592_v43 = vadd.f32 2.4451342, %v584_v32  ;;  %v1346_v62 = vpop.eup %835  ;;  %v594_v10 = vmul.f32 %v586_v25, %v1215_v9  ;;  %v595_v11 = vmul.f32 %v587_v60, %v1224_v44  ;;  %v596_v23 = vmul.f32 %v588_v28, %v1233_v47 }
  0x8e   :  { %v597_v13 = vmul.f32 %v589_v29, %v1242_v21  ;;  %v598_v33 = vmul.f32 %v590_v36, %v1251_v34  ;;  %v599_v41 = vmul.f32 %v591_v63, %v1274_v26  ;;  %v601_v20 = vadd.f32 3.7544086, %v593_v8 }
  0x8f   :  { %v600_v24 = vmul.f32 %v592_v43, %v1276_v17  ;;  %v1355_v2 = vpop.eup %837  ;;  %v530_v37 = vmul.f32 %v522_v7, %v1215_v9  ;;  %v602_v48 = vadd.f32 3.7544086, %v594_v10  ;;  %v603_v12 = vadd.f32 3.7544086, %v595_v11 }
  0x90   :  { %v604_v15 = vadd.f32 3.7544086, %v596_v23  ;;  %v1358_v18 = vpop.eup %839  ;;  %v605_v16 = vadd.f32 3.7544086, %v597_v13  ;;  %v606_v32 = vadd.f32 3.7544086, %v598_v33  ;;  %v609_v25 = vmul.f32 %v601_v20, %v1208_v0 }
  0x91   :  { %v607_v52 = vadd.f32 3.7544086, %v599_v41  ;;  %v1361_v60 = vpop.eup %841  ;;  %v608_v28 = vadd.f32 3.7544086, %v600_v24  ;;  %v610_v29 = vmul.f32 %v602_v48, %v1215_v9  ;;  %v611_v36 = vmul.f32 %v603_v12, %v1224_v44 }
  0x92   :  { %v612_v63 = vmul.f32 %v604_v15, %v1233_v47  ;;  %v1366_v7 = vpop.eup %843  ;;  %v613_v43 = vmul.f32 %v605_v16, %v1242_v21  ;;  %v614_v8 = vmul.f32 %v606_v32, %v1251_v34  ;;  %v617_v11 = vadd.f32 1.0, %v609_v25 }
  0x93   :  { %v615_v10 = vmul.f32 %v607_v52, %v1274_v26  ;;  %v616_v23 = vmul.f32 %v608_v28, %v1276_v17  ;;  %v618_v13 = vadd.f32 1.0, %v610_v29  ;;  %v619_v33 = vadd.f32 1.0, %v611_v36 }
  0x94   :  { %v620_v41 = vadd.f32 1.0, %v612_v63  ;;  %v527_v24 = vadd.f32 -2.5497324, %v1325_v14  ;;  %v531_v20 = vmul.f32 %v1310_v61, %v1224_v44  ;;  %v621_v48 = vadd.f32 1.0, %v613_v43 }
  0x95   :  { %845 = vrcp.f32 %v617_v11  ;;  %v528_v12 = vadd.f32 -2.5497324, %v1328_v45  ;;  %v532_v15 = vmul.f32 %v1312_v1, %v1233_v47  ;;  %v622_v16 = vadd.f32 1.0, %v614_v8 }
  0x96   :  { %847 = vrcp.f32 %v618_v13  ;;  %v533_v32 = vmul.f32 %v1316_v38, %v1242_v21  ;;  %v537_v52 = vadd.f32 4.3746643, %v529_v22  ;;  %v623_v25 = vadd.f32 1.0, %v615_v10 }
  0x97   :  { %849 = vrcp.f32 %v619_v33  ;;  %v534_v14 = vmul.f32 %v1320_v46, %v1251_v34  ;;  %v538_v28 = vadd.f32 4.3746643, %v530_v37  ;;  %v624_v61 = vadd.f32 1.0, %v616_v23 }
  0x98   :  { %851 = vrcp.f32 %v620_v41  ;;  %v535_v29 = vmul.f32 %v527_v24, %v1274_v26  ;;  %v539_v45 = vadd.f32 4.3746643, %v531_v20  ;;  %v286_v1 = vmul.f32 %v964_v3, %v1140_v49  ;;  %v1487_v20 = vld [vmem:[#allocation11_spill] sm:$0xff] }
  0x99   :  { %853 = vrcp.f32 %v621_v48  ;;  %v536_v36 = vmul.f32 %v528_v12, %v1276_v17  ;;  %v540_v63 = vadd.f32 4.3746643, %v532_v15  ;;  %v287_v38 = vmul.f32 %v971_v5, %v1142_v30  ;;  %v1489_v12 = vld [vmem:[#allocation17_spill] sm:$0xff] }
  0x9a   :  { %855 = vrcp.f32 %v622_v16  ;;  %v541_v22 = vadd.f32 4.3746643, %v533_v32  ;;  %v545_v46 = vmul.f32 %v537_v52, %v1208_v0  ;;  %v542_v37 = vadd.f32 4.3746643, %v534_v14  ;;  %v1490_v16 = vld [vmem:[#allocation18_spill] sm:$0xff] }
  0x9b   :  { %857 = vrcp.f32 %v623_v25  ;;  %v546_v43 = vmul.f32 %v538_v28, %v1215_v9  ;;  %v906_v8 = vmov 1983009808   ;;  %v288_v3 = vmul.f32 %v974_v6, %v1149_v19 }
  0x9c   :  { %859 = vrcp.f32 %v624_v61  ;;  %v702_v10 = vunpack.c.l.s4 %v906_v8  ;;  %v543_v49 = vadd.f32 4.3746643, %v535_v29  ;;  %v547_v11 = vmul.f32 %v539_v45, %v1224_v44  ;;  %v1493_v61 = vld [vmem:[#allocation15_spill] sm:$0xff]  ;;  %v1494_v29 = vld [vmem:[#allocation10_spill] sm:$0xff] }
  0x9d   :  { %vm641_vm0 = vcmp.lt.f32.partialorder %v932_v51, 0.5  ;;  %v544_v23 = vadd.f32 4.3746643, %v536_v36  ;;  %v548_v5 = vmul.f32 %v540_v63, %v1233_v47  ;;  %vm642_vm1 = vcmp.lt.f32.partialorder %v934_v54, 0.5 }
  0x9e   :  { %vm643_vm2 = vcmp.lt.f32.partialorder %v936_v55, 0.5  ;;  %v549_v30 = vmul.f32 %v541_v22, %v1242_v21  ;;  %v553_v0 = vadd.f32 2.938164, %v545_v46  ;;  %vm644_vm3 = vcmp.lt.f32.partialorder %v941_v57, 0.5 }
  0x9f   :  { %vm665_vm4 = vcmp.lt.f32.partialorder %v1035_v27, 0.02425  ;;  %vm666_vm5 = vcmp.lt.f32.partialorder %v1039_v31, 0.02425  ;;  %v550_v6 = vmul.f32 %v542_v37, %v1251_v34  ;;  %v554_v19 = vadd.f32 2.938164, %v546_v43 }
  0xa0   :  { %vm645_vm6 = vcmp.lt.f32.partialorder %v943_v58, 0.5  ;;  %vm667_vm7 = vcmp.lt.f32.partialorder %v1045_v35, 0.02425  ;;  %v703_v9 = vunpack.c.0.s8 %v702_v10  ;;  %v551_v44 = vmul.f32 %v543_v49, %v1274_v26  ;;  %v1486_v34 = vld [vmem:[#allocation16_spill] sm:$0xff]  ;;  %v1488_v26 = vld [vmem:[#allocation13_spill] sm:$0xff] }
  0xa1   :  { %v555_v47 = vadd.f32 2.938164, %v547_v11  ;;  %vm646_vm8 = vcmp.lt.f32.partialorder %v945_v59, 0.5  ;;  %vm668_vm9 = vcmp.lt.f32.partialorder %v1051_v39, 0.02425  ;;  %v370_v13 = vmul.f32 %v1336_v56, %v1146_v53  ;;  %v1491_v53 = vld [vmem:[#allocation12_spill] sm:$0xff] }
  0xa2   :  { %vm669_vm10 = vcmp.lt.f32.partialorder %v1055_v42, 0.02425  ;;  %v846_v21 = vpop.eup %845  ;;  %v372_v33 = vmul.f32 %v1340_v4, %v1486_v34  ;;  %v552_v41 = vmul.f32 %v544_v23, %v1276_v17  ;;  %v556_v24 = vadd.f32 2.938164, %v548_v5  ;;  %v1492_v56 = vld [vmem:[#allocation14_spill] sm:$0xff] }
  0xa3   :  { %vm647_vm11 = vcmp.lt.f32.partialorder %v1487_v20, 0.5  ;;  %vm670_vm12 = vcmp.lt.f32.partialorder %v1488_v26, 0.02425  ;;  %v848_v48 = vpop.eup %847  ;;  %v374_v15 = vmul.f32 %v1343_v50, %v1489_v12  ;;  %v376_v32 = vmul.f32 %v1346_v62, %v1490_v16 }
  0xa4   :  { %v557_v52 = vadd.f32 2.938164, %v549_v30  ;;  %v626_v25 = vmul.f32 %v846_v21, %v553_v0  ;;  %vm648_vm13 = vcmp.lt.f32.partialorder %v1491_v53, 0.5  ;;  %vm671_vm14 = vcmp.lt.f32.partialorder %v1492_v56, 0.02425  ;;  %v850_v4 = vpop.eup %849 }
  0xa5   :  { %v378_v17 = vmul.f32 %v1355_v2, %v1295_v40  ;;  %v558_v14 = vadd.f32 2.938164, %v550_v6  ;;  %v628_v28 = vmul.f32 %v848_v48, %v554_v19  ;;  %vm672_vm15 = vcmp.lt.f32.partialorder %v1493_v61, 0.02425  ;;  %v852_v50 = vpop.eup %851 }
  0xa6   :  { %v706_v45 = vsub.s32 %v703_v9, %v1494_v29  ;;  %v380_v36 = vmul.f32 %v1358_v18, %v286_v1  ;;  %v559_v62 = vadd.f32 2.938164, %v551_v44  ;;  %v630_v63 = vmul.f32 %v850_v4, %v555_v47  ;;  %v854_v46 = vpop.eup %853 }
  0xa7   :  { %v649_v22 = vsub.f32 0.0, %v626_v25  ;;  %v382_v37 = vmul.f32 %v1361_v60, %v287_v38  ;;  %v560_v43 = vadd.f32 2.938164, %v552_v41  ;;  %v632_v8 = vmul.f32 %v852_v50, %v556_v24  ;;  %v856_v49 = vpop.eup %855 }
  0xa8   :  { %v650_v10 = vsub.f32 0.0, %v628_v28  ;;  %v384_v40 = vmul.f32 %v1366_v7, %v288_v3  ;;  %v634_v2 = vmul.f32 %v854_v46, %v557_v52  ;;  %v651_v11 = vsub.f32 0.0, %v630_v63  ;;  %v858_v5 = vpop.eup %857  ;;  %v689_v52 = vld [vmem:[#allocation4] sm:$0xff] }
  0xa9   :  { %v657_v23 = vsel %vm641_vm0, %v626_v25, %v649_v22  ;;  %v636_v30 = vmul.f32 %v856_v49, %v558_v14  ;;  %v652_v18 = vsub.f32 0.0, %v632_v8  ;;  %v860_v38 = vpop.eup %859  ;;  %v638_v0 = vmul.f32 %v858_v5, %v559_v62  ;;  %v690_v14 = vld [vmem:[#allocation4 + $0x8] sm:$0xff] }
  0xaa   :  { %v658_v1 = vsel %vm642_vm1, %v628_v28, %v650_v10  ;;  %v673_v60 = vsel %vm665_vm4, %v657_v23, %v370_v13  ;;  %v653_v6 = vsub.f32 0.0, %v634_v2  ;;  %v659_v7 = vsel %vm643_vm2, %v630_v63, %v651_v11 }
  0xab   :  { %v674_v3 = vsel %vm666_vm5, %v658_v1, %v372_v33  ;;  %v640_v51 = vmul.f32 %v860_v38, %v560_v43  ;;  %v654_v19 = vsub.f32 0.0, %v636_v30  ;;  %v660_v9 = vsel %vm644_vm3, %v632_v8, %v652_v18 }
  0xac   :  { %v675_v54 = vsel %vm667_vm7, %v659_v7, %v374_v15  ;;  %v655_v44 = vsub.f32 0.0, %v638_v0  ;;  %v661_v27 = vsel %vm645_vm6, %v634_v2, %v653_v6  ;;  %v676_v47 = vsel %vm668_vm9, %v660_v9, %v376_v32 }
  0xad   :  { %v681_v55 = vmul.f32 0.1, %v673_v60  ;;  %v656_v21 = vsub.f32 0.0, %v640_v51  ;;  %v662_v31 = vsel %vm646_vm8, %v636_v30, %v654_v19  ;;  %v677_v13 = vsel %vm669_vm10, %v661_v27, %v378_v17 }
  0xae   :  { %v682_v57 = vmul.f32 0.1, %v674_v3  ;;  %v663_v35 = vsel %vm647_vm11, %v638_v0, %v655_v44  ;;  %v678_v34 = vsel %vm670_vm12, %v662_v31, %v380_v36  ;;  %v683_v58 = vmul.f32 0.1, %v675_v54 }
  0xaf   :  { %v684_v33 = vmul.f32 0.1, %v676_v47  ;;  %v664_v39 = vsel %vm648_vm13, %v640_v51, %v656_v21  ;;  %v679_v41 = vsel %vm671_vm14, %v663_v35, %v382_v37  ;;  %v685_v59 = vmul.f32 0.1, %v677_v13 }
  0xb0   :  { %v686_v24 = vmul.f32 0.1, %v678_v34  ;;  %v680_v42 = vsel %vm672_vm15, %v664_v39, %v384_v40  ;;  %v687_v48 = vmul.f32 0.1, %v679_v41  ;;  %v699_v12 = vcombine.low %v681_v55, %v682_v57 }
  0xb1   :  { %v700_v20 = vcombine.low %v683_v58, %v684_v33  ;;  %v688_v15 = vmul.f32 0.1, %v680_v42 }
  0xb2   :  { %v716_v16 = vcombine.low %v685_v59, %v686_v24  ;;  %v707_v26 = vrot.slane %v699_v12, %v706_v45 }
  0xb3   :  { %v714_v32 = vrot.slane %v700_v20, %v706_v45  ;;  %v717_v25 = vcombine.low %v687_v48, %v688_v15 }
  0xb4   :  { %v724_v4 = vrot.slane %v716_v16, %v706_v45 }
  0xb5   :  { %v715_v53 = vcombine.low %v707_v26, %v714_v32  ;;  %v731_v17 = vrot.slane %v717_v25, %v706_v45 }
  0xb7   :  { %v735_v56 = vadd.f32 %v715_v53, %v689_v52  ;;  %v732_v28 = vcombine.low %v724_v4, %v731_v17 }
  0xb9   :  { %737 = vst [vmem:[#allocation7] sm:$0xff] %v735_v56  ;;  %v736_v61 = vadd.f32 %v732_v28, %v690_v14 }
  0xbb   :  { %738 = vst [vmem:[#allocation7 + $0x8] sm:$0xff] %v736_v61 }
  0xbc   :  { %892 = shalt.err (!%p889_p9)
}
  0xbd   :  { %748 = dma.vmem_to_hbm [thread:$0]  %s746_s1, 256, %s1465_s2, [#allocation6]  }
  0xbe   :  { %903 = dma.done.wait [#allocation6], 256  }
  0xbf   :  { %904 = vsyncadd [#allocation6], 4294967040 }
  0xc0   :  { %752 = vsyncpa [#allocation5], 1 }
  0xc1   :  { %753 = vsyncpa [#allocation6], 1 }

</bundles_post_ra>
